<compile_context>
chip_gen: v7x
topology: tpu7x:2x2x1
jax: 0.10.0
libtpu: 0.0.40
codegen_flags: <defaults>
</compile_context>

<pallas_src>
import jax
import jax.numpy as jnp
from jax.experimental import pallas as pl
from jax.experimental.pallas import tpu as pltpu

KERNEL_SIZE = 7
PAD = KERNEL_SIZE // 2


# ---------------------------------------------------------------------------
# Generation-aware budgets.
# ---------------------------------------------------------------------------
def _budgets():
    """Returns (per-input-block VMEM budget, vmem_limit_bytes)."""
    try:
        kind = jax.devices()[0].device_kind.lower()
    except Exception:
        kind = ""
    if "v5 lite" in kind or "v5e" in kind or "v5lite" in kind:
        # v5e: 128 MiB physical, 16 MiB scoped default -> raise the limit explicitly.
        return 8 << 20, 40 << 20
    if "v6" in kind:
        # v6e: 128 MiB physical VMEM.
        return 12 << 20, 56 << 20
    if "v7" in kind or "tpu7" in kind:
        # v7x: only 64 MiB physical VMEM per TC -> keep headroom.
        return 8 << 20, 44 << 20
    # Safe everywhere (smallest physical VMEM across generations is 64 MiB).
    return 8 << 20, 40 << 20


def _stage1_tiles(B, C, L, itemsize, budget_bytes):
    """Pick (TB, TL) jointly so one (TB, C, TL) input block reaches the VMEM budget.

    VMEM footprint accounts for sublane padding of the channel axis
    (f32 -> 8, bf16 -> 16, int8 -> 32) and lane padding of TL.
    """
    pack = max(8, 32 // max(1, itemsize))
    c_pad = -(-C // pack) * pack
    lane_col_bytes = c_pad * itemsize            # bytes per (batch, lane) column incl. pad
    tl = budget_bytes // lane_col_bytes
    if tl >= L:
        tl = L                                   # whole length in one block -> fused path
    else:
        tl = max(128, (tl // 128) * 128)         # lane-aligned
    tl_pad = -(-tl // 128) * 128
    tb = min(B, max(1, budget_bytes // (lane_col_bytes * tl_pad)))
    return tb, tl


# ---------------------------------------------------------------------------
# Shared 7-tap conv + sigmoid (roll taps on XLU, zero-padding via lane mask).
# ---------------------------------------------------------------------------
def _conv7_sigmoid(w_ref, avg, mx):
    # w_ref: SMEM (2*K,) f32 scalars (first K = avg taps, next K = max taps).
    # avg / mx: (TB, L) f32.
    tb, length = avg.shape
    lane = jax.lax.broadcasted_iota(jnp.int32, (tb, length), 1)
    acc = jnp.zeros((tb, length), jnp.float32)
    for j in range(KERNEL_SIZE):
        off = j - PAD                           # this tap reads src[l + off]
        shift = (-off) % length                 # rolled[l] == src[(l + off) mod L]
        a = avg if shift == 0 else pltpu.roll(avg, shift=shift, axis=1)
        m = mx if shift == 0 else pltpu.roll(mx, shift=shift, axis=1)
        tap = w_ref[j] * a + w_ref[KERNEL_SIZE + j] * m
        valid = (lane + off >= 0) & (lane + off < length)   # Conv1d zero padding
        acc = acc + jnp.where(valid, tap, 0.0)
    return jax.nn.sigmoid(acc)


# ---------------------------------------------------------------------------
# Fused path: channel mean/max + conv + sigmoid in one kernel (L in one tile).
# ---------------------------------------------------------------------------
def _fused_kernel(w_ref, x_ref, o_ref):
    # w_ref: SMEM (2*K,)    x_ref: (TB, C, L)    o_ref: (TB, L)
    x = x_ref[...].astype(jnp.float32)
    avg = jnp.mean(x, axis=1)
    mx = jnp.max(x, axis=1)
    o_ref[...] = _conv7_sigmoid(w_ref, avg, mx).astype(o_ref.dtype)


def _fused_forward(x, w_flat, tb, vmem_limit):
    B, C, L = x.shape
    itemsize = jnp.dtype(x.dtype).itemsize
    return pl.pallas_call(
        _fused_kernel,
        out_shape=jax.ShapeDtypeStruct((B, L), x.dtype),
        grid_spec=pltpu.PrefetchScalarGridSpec(
            num_scalar_prefetch=0,
            grid=(pl.cdiv(B, tb),),
            in_specs=[
                pl.BlockSpec(memory_space=pltpu.MemorySpace.SMEM),   # 14 weight scalars
                pl.BlockSpec((tb, C, L), lambda b: (b, 0, 0)),
            ],
            out_specs=pl.BlockSpec((tb, L), lambda b: (b, 0)),
        ),
        compiler_params=pltpu.CompilerParams(
            dimension_semantics=("parallel",),
            vmem_limit_bytes=vmem_limit),
        cost_estimate=pl.CostEstimate(
            flops=2 * B * C * L + 4 * KERNEL_SIZE * B * L,
            transcendentals=B * L,
            bytes_accessed=B * C * L * itemsize + B * L * itemsize),
    )(w_flat, x)


# ---------------------------------------------------------------------------
# Two-stage path, stage 1: channel-wise mean / max reduction (HBM-bound).
# ---------------------------------------------------------------------------
def _reduce_kernel(x_ref, avg_ref, max_ref):
    # x_ref: (TB, C, TL)    avg_ref / max_ref: (TB, TL)
    x = x_ref[...].astype(jnp.float32)
    avg_ref[...] = jnp.mean(x, axis=1).astype(avg_ref.dtype)
    max_ref[...] = jnp.max(x, axis=1).astype(max_ref.dtype)


def _channel_mean_max(x, tb, tl, vmem_limit):
    B, C, L = x.shape
    itemsize = jnp.dtype(x.dtype).itemsize
    # L-tiles lead the grid: in the tiled path there are >= 2 of them, so the
    # leading "parallel" axis always gives both v7x TensorCores work.
    grid = (pl.cdiv(L, tl), pl.cdiv(B, tb))
    return pl.pallas_call(
        _reduce_kernel,
        out_shape=(jax.ShapeDtypeStruct((B, L), jnp.float32),
                   jax.ShapeDtypeStruct((B, L), jnp.float32)),
        grid_spec=pltpu.PrefetchScalarGridSpec(
            num_scalar_prefetch=0,
            grid=grid,
            in_specs=[pl.BlockSpec((tb, C, tl), lambda i, b: (b, 0, i))],
            out_specs=[pl.BlockSpec((tb, tl), lambda i, b: (b, i)),
                       pl.BlockSpec((tb, tl), lambda i, b: (b, i))],
        ),
        compiler_params=pltpu.CompilerParams(
            dimension_semantics=("parallel", "parallel"),
            vmem_limit_bytes=vmem_limit),
        cost_estimate=pl.CostEstimate(
            flops=2 * B * C * L,
            transcendentals=0,
            bytes_accessed=B * C * L * itemsize + 2 * B * L * 4),
    )(x)


# ---------------------------------------------------------------------------
# Two-stage path, stage 2: 7-tap conv + sigmoid on the tiny (B, 2, L) data.
# ---------------------------------------------------------------------------
def _conv_sigmoid_kernel(w_ref, avg_ref, max_ref, o_ref):
    o_ref[...] = _conv7_sigmoid(w_ref, avg_ref[...], max_ref[...]).astype(o_ref.dtype)


def _conv_sigmoid(avg, mx, w_flat, out_dtype, vmem_limit):
    B, L = avg.shape
    l_pad = -(-L // 128) * 128
    # ~3 f32 (tb, L) arrays x 2 buffers per step; keep the total under ~16 MiB,
    # otherwise use the whole batch in one step (data is tiny).
    tb = min(B, max(1, (16 << 20) // (6 * l_pad * 4)))
    return pl.pallas_call(
        _conv_sigmoid_kernel,
        out_shape=jax.ShapeDtypeStruct((B, L), out_dtype),
        grid_spec=pltpu.PrefetchScalarGridSpec(
            num_scalar_prefetch=0,
            grid=(pl.cdiv(B, tb),),
            in_specs=[
                pl.BlockSpec(memory_space=pltpu.MemorySpace.SMEM),   # 14 weight scalars
                pl.BlockSpec((tb, L), lambda b: (b, 0)),
                pl.BlockSpec((tb, L), lambda b: (b, 0)),
            ],
            out_specs=pl.BlockSpec((tb, L), lambda b: (b, 0)),
        ),
        compiler_params=pltpu.CompilerParams(
            dimension_semantics=("parallel",),
            vmem_limit_bytes=vmem_limit),
        cost_estimate=pl.CostEstimate(
            flops=4 * KERNEL_SIZE * B * L,
            transcendentals=B * L,
            bytes_accessed=2 * B * L * 4 + B * L * jnp.dtype(out_dtype).itemsize),
    )(w_flat, avg, mx)


# ---------------------------------------------------------------------------
# Public forward + pure-JAX reference.
# ---------------------------------------------------------------------------
def sab_forward(x, weight, *, block_budget_bytes=None):
    """x: (B, C, L), weight: (1, 2, K)  ->  (B, 1, L)."""
    B, C, L = x.shape
    budget, vmem_limit = _budgets()
    if block_budget_bytes is not None:     # testing hook / manual override
        budget = block_budget_bytes
    itemsize = jnp.dtype(x.dtype).itemsize
    tb, tl = _stage1_tiles(B, C, L, itemsize, budget)
    w_flat = weight.reshape(2 * KERNEL_SIZE).astype(jnp.float32)

    if tl >= L:
        # Fused single-kernel path. If the whole batch landed in one grid step and
        # the data is big enough to care, split it so v7x's 2nd TensorCore gets work.
        pack = max(8, 32 // max(1, itemsize))
        c_pad = -(-C // pack) * pack
        block_bytes = tb * c_pad * itemsize * (-(-L // 128) * 128)
        if pl.cdiv(B, tb) == 1 and B >= 2 and block_bytes > (2 << 20):
            tb = -(-B // 2)
        out = _fused_forward(x, w_flat, tb, vmem_limit)
    else:
        avg, mx = _channel_mean_max(x, tb, tl, vmem_limit)
        out = _conv_sigmoid(avg, mx, w_flat, x.dtype, vmem_limit)
    return out.reshape(B, 1, L)


def sab_reference(x, weight):
    avg = jnp.mean(x, axis=1, keepdims=True)
    mx = jnp.max(x, axis=1, keepdims=True)
    cat = jnp.concatenate([avg, mx], axis=1)          # (B, 2, L)
    out = jax.lax.conv_general_dilated(
        cat, weight, window_strides=(1,), padding=[(PAD, PAD)],
        dimension_numbers=("NCH", "OIH", "NCH"))
    return jax.nn.sigmoid(out)


if __name__ == "__main__":
    key = jax.random.PRNGKey(0)
    kx, kw, kx2, kx3 = jax.random.split(key, 4)

    # Conv1d(2, 1, 7, bias=False) with 'normal' init: N(0, 0.02), no bias.
    weight = 0.02 * jax.random.normal(kw, (1, 2, KERNEL_SIZE), dtype=jnp.float32)

    # 1) Small shape matching the module's forward -> fused single-kernel path.
    B, C, L = 2, 4, 16
    x = jax.random.normal(kx, (B, C, L), dtype=jnp.float32)
    out = jax.block_until_ready(sab_forward(x, weight))
    ref = sab_reference(x, weight)
    assert out.shape == (B, 1, L)
    assert jnp.allclose(out, ref, atol=1e-5, rtol=1e-5), "mismatch vs reference (fused)"

    # 2) Two-stage tiled-L path (forced via a small block budget): exercises partial
    #    L tiles, multiple batch tiles, and the separate conv kernel.
    B2, C2, L2 = 3, 16, 2304
    x2 = jax.random.normal(kx2, (B2, C2, L2), dtype=jnp.float32)
    out2 = jax.block_until_ready(sab_forward(x2, weight, block_budget_bytes=64 << 10))
    ref2 = sab_reference(x2, weight)
    assert out2.shape == (B2, 1, L2)
    assert jnp.allclose(out2, ref2, atol=1e-5, rtol=1e-5), "mismatch vs reference (two-stage)"

    # 3) Fused path with multiple / partial batch tiles (forced via a tiny budget).
    B3, C3, L3 = 5, 4, 128
    x3 = jax.random.normal(kx3, (B3, C3, L3), dtype=jnp.float32)
    out3 = jax.block_until_ready(sab_forward(x3, weight, block_budget_bytes=8 << 10))
    ref3 = sab_reference(x3, weight)
    assert out3.shape == (B3, 1, L3)
    assert jnp.allclose(out3, ref3, atol=1e-5, rtol=1e-5), "mismatch vs reference (batch-tiled fused)"

    print("KERNEL_OK")
</pallas_src>

<mosaic_0001>
module attributes {stable_mosaic.version = 11 : i64} {
  func.func @_fused_kernel(%arg0: i32, %arg1: memref<14xf32, #tpu.memory_space<smem>>, %arg2: memref<2x4x16xf32, #tpu.memory_space<vmem>>, %arg3: memref<2x16xf32, #tpu.memory_space<vmem>>) attributes {dimension_semantics = [#tpu.dimension_semantics<parallel>], iteration_bounds = array<i64: 1>, scalar_prefetch = 0 : i64, scratch_operands = 0 : i64, tpu.core_type = #tpu.core_type<tc>, window_params = [{transform_indices = @transform_0, window_bounds = array<i64: 14>}, {transform_indices = @transform_1, window_bounds = array<i64: 2, 4, 16>}, {transform_indices = @transform_2, window_bounds = array<i64: 2, 16>}]} {
    %c0 = arith.constant 0 : index
    %c0_0 = arith.constant 0 : index
    %c0_1 = arith.constant 0 : index
    %0 = vector.load %arg2[%c0, %c0_0, %c0_1] : memref<2x4x16xf32, #tpu.memory_space<vmem>>, vector<2x4x16xf32>
    %cst = arith.constant dense<0.000000e+00> : vector<2x16xf32>
    %1 = vector.multi_reduction <add>, %0, %cst [1] : vector<2x4x16xf32> to vector<2x16xf32>
    %cst_2 = arith.constant 4.000000e+00 : f32
    %2 = vector.broadcast %cst_2 : f32 to vector<2x16xf32>
    %3 = arith.divf %1, %2 : vector<2x16xf32>
    %cst_3 = arith.constant dense<0xFF800000> : vector<2x16xf32>
    %4 = vector.multi_reduction <maximumf>, %0, %cst_3 [1] : vector<2x4x16xf32> to vector<2x16xf32>
    %5 = tpu.iota {dimensions = array<i32: 1>} : vector<2x16xi32>
    %cst_4 = arith.constant 0.000000e+00 : f32
    %6 = vector.broadcast %cst_4 : f32 to vector<2x16xf32>
    %c3_i32 = arith.constant 3 : i32
    %7 = tpu.dynamic_rotate %3 by %c3_i32 dim 1 : vector<2x16xf32>, i32 -> vector<2x16xf32>
    %c3_i32_5 = arith.constant 3 : i32
    %8 = tpu.dynamic_rotate %4 by %c3_i32_5 dim 1 : vector<2x16xf32>, i32 -> vector<2x16xf32>
    %c0_6 = arith.constant 0 : index
    %9 = memref.load %arg1[%c0_6] : memref<14xf32, #tpu.memory_space<smem>>
    %10 = vector.broadcast %9 : f32 to vector<2x16xf32>
    %11 = arith.mulf %10, %7 : vector<2x16xf32>
    %c7 = arith.constant 7 : index
    %12 = memref.load %arg1[%c7] : memref<14xf32, #tpu.memory_space<smem>>
    %13 = vector.broadcast %12 : f32 to vector<2x16xf32>
    %14 = arith.mulf %13, %8 : vector<2x16xf32>
    %15 = arith.addf %11, %14 : vector<2x16xf32>
    %c-3_i32 = arith.constant -3 : i32
    %16 = vector.broadcast %c-3_i32 : i32 to vector<2x16xi32>
    %17 = arith.addi %5, %16 : vector<2x16xi32>
    %c0_i32 = arith.constant 0 : i32
    %18 = vector.broadcast %c0_i32 : i32 to vector<2x16xi32>
    %19 = arith.cmpi sge, %17, %18 : vector<2x16xi32>
    %c-3_i32_7 = arith.constant -3 : i32
    %20 = vector.broadcast %c-3_i32_7 : i32 to vector<2x16xi32>
    %21 = arith.addi %5, %20 : vector<2x16xi32>
    %c16_i32 = arith.constant 16 : i32
    %22 = vector.broadcast %c16_i32 : i32 to vector<2x16xi32>
    %23 = arith.cmpi slt, %21, %22 : vector<2x16xi32>
    %24 = arith.andi %19, %23 : vector<2x16xi1>
    %cst_8 = arith.constant 0.000000e+00 : f32
    %25 = vector.broadcast %cst_8 : f32 to vector<2x16xf32>
    %26 = arith.select %24, %15, %25 : vector<2x16xi1>, vector<2x16xf32>
    %27 = arith.addf %6, %26 : vector<2x16xf32>
    %c2_i32 = arith.constant 2 : i32
    %28 = tpu.dynamic_rotate %3 by %c2_i32 dim 1 : vector<2x16xf32>, i32 -> vector<2x16xf32>
    %c2_i32_9 = arith.constant 2 : i32
    %29 = tpu.dynamic_rotate %4 by %c2_i32_9 dim 1 : vector<2x16xf32>, i32 -> vector<2x16xf32>
    %c1 = arith.constant 1 : index
    %30 = memref.load %arg1[%c1] : memref<14xf32, #tpu.memory_space<smem>>
    %31 = vector.broadcast %30 : f32 to vector<2x16xf32>
    %32 = arith.mulf %31, %28 : vector<2x16xf32>
    %c8 = arith.constant 8 : index
    %33 = memref.load %arg1[%c8] : memref<14xf32, #tpu.memory_space<smem>>
    %34 = vector.broadcast %33 : f32 to vector<2x16xf32>
    %35 = arith.mulf %34, %29 : vector<2x16xf32>
    %36 = arith.addf %32, %35 : vector<2x16xf32>
    %c-2_i32 = arith.constant -2 : i32
    %37 = vector.broadcast %c-2_i32 : i32 to vector<2x16xi32>
    %38 = arith.addi %5, %37 : vector<2x16xi32>
    %c0_i32_10 = arith.constant 0 : i32
    %39 = vector.broadcast %c0_i32_10 : i32 to vector<2x16xi32>
    %40 = arith.cmpi sge, %38, %39 : vector<2x16xi32>
    %c-2_i32_11 = arith.constant -2 : i32
    %41 = vector.broadcast %c-2_i32_11 : i32 to vector<2x16xi32>
    %42 = arith.addi %5, %41 : vector<2x16xi32>
    %c16_i32_12 = arith.constant 16 : i32
    %43 = vector.broadcast %c16_i32_12 : i32 to vector<2x16xi32>
    %44 = arith.cmpi slt, %42, %43 : vector<2x16xi32>
    %45 = arith.andi %40, %44 : vector<2x16xi1>
    %cst_13 = arith.constant 0.000000e+00 : f32
    %46 = vector.broadcast %cst_13 : f32 to vector<2x16xf32>
    %47 = arith.select %45, %36, %46 : vector<2x16xi1>, vector<2x16xf32>
    %48 = arith.addf %27, %47 : vector<2x16xf32>
    %c1_i32 = arith.constant 1 : i32
    %49 = tpu.dynamic_rotate %3 by %c1_i32 dim 1 : vector<2x16xf32>, i32 -> vector<2x16xf32>
    %c1_i32_14 = arith.constant 1 : i32
    %50 = tpu.dynamic_rotate %4 by %c1_i32_14 dim 1 : vector<2x16xf32>, i32 -> vector<2x16xf32>
    %c2 = arith.constant 2 : index
    %51 = memref.load %arg1[%c2] : memref<14xf32, #tpu.memory_space<smem>>
    %52 = vector.broadcast %51 : f32 to vector<2x16xf32>
    %53 = arith.mulf %52, %49 : vector<2x16xf32>
    %c9 = arith.constant 9 : index
    %54 = memref.load %arg1[%c9] : memref<14xf32, #tpu.memory_space<smem>>
    %55 = vector.broadcast %54 : f32 to vector<2x16xf32>
    %56 = arith.mulf %55, %50 : vector<2x16xf32>
    %57 = arith.addf %53, %56 : vector<2x16xf32>
    %c-1_i32 = arith.constant -1 : i32
    %58 = vector.broadcast %c-1_i32 : i32 to vector<2x16xi32>
    %59 = arith.addi %5, %58 : vector<2x16xi32>
    %c0_i32_15 = arith.constant 0 : i32
    %60 = vector.broadcast %c0_i32_15 : i32 to vector<2x16xi32>
    %61 = arith.cmpi sge, %59, %60 : vector<2x16xi32>
    %c-1_i32_16 = arith.constant -1 : i32
    %62 = vector.broadcast %c-1_i32_16 : i32 to vector<2x16xi32>
    %63 = arith.addi %5, %62 : vector<2x16xi32>
    %c16_i32_17 = arith.constant 16 : i32
    %64 = vector.broadcast %c16_i32_17 : i32 to vector<2x16xi32>
    %65 = arith.cmpi slt, %63, %64 : vector<2x16xi32>
    %66 = arith.andi %61, %65 : vector<2x16xi1>
    %cst_18 = arith.constant 0.000000e+00 : f32
    %67 = vector.broadcast %cst_18 : f32 to vector<2x16xf32>
    %68 = arith.select %66, %57, %67 : vector<2x16xi1>, vector<2x16xf32>
    %69 = arith.addf %48, %68 : vector<2x16xf32>
    %c3 = arith.constant 3 : index
    %70 = memref.load %arg1[%c3] : memref<14xf32, #tpu.memory_space<smem>>
    %71 = vector.broadcast %70 : f32 to vector<2x16xf32>
    %72 = arith.mulf %71, %3 : vector<2x16xf32>
    %c10 = arith.constant 10 : index
    %73 = memref.load %arg1[%c10] : memref<14xf32, #tpu.memory_space<smem>>
    %74 = vector.broadcast %73 : f32 to vector<2x16xf32>
    %75 = arith.mulf %74, %4 : vector<2x16xf32>
    %76 = arith.addf %72, %75 : vector<2x16xf32>
    %c0_i32_19 = arith.constant 0 : i32
    %77 = vector.broadcast %c0_i32_19 : i32 to vector<2x16xi32>
    %78 = arith.addi %5, %77 : vector<2x16xi32>
    %c0_i32_20 = arith.constant 0 : i32
    %79 = vector.broadcast %c0_i32_20 : i32 to vector<2x16xi32>
    %80 = arith.cmpi sge, %78, %79 : vector<2x16xi32>
    %c0_i32_21 = arith.constant 0 : i32
    %81 = vector.broadcast %c0_i32_21 : i32 to vector<2x16xi32>
    %82 = arith.addi %5, %81 : vector<2x16xi32>
    %c16_i32_22 = arith.constant 16 : i32
    %83 = vector.broadcast %c16_i32_22 : i32 to vector<2x16xi32>
    %84 = arith.cmpi slt, %82, %83 : vector<2x16xi32>
    %85 = arith.andi %80, %84 : vector<2x16xi1>
    %cst_23 = arith.constant 0.000000e+00 : f32
    %86 = vector.broadcast %cst_23 : f32 to vector<2x16xf32>
    %87 = arith.select %85, %76, %86 : vector<2x16xi1>, vector<2x16xf32>
    %88 = arith.addf %69, %87 : vector<2x16xf32>
    %c15_i32 = arith.constant 15 : i32
    %89 = tpu.dynamic_rotate %3 by %c15_i32 dim 1 : vector<2x16xf32>, i32 -> vector<2x16xf32>
    %c15_i32_24 = arith.constant 15 : i32
    %90 = tpu.dynamic_rotate %4 by %c15_i32_24 dim 1 : vector<2x16xf32>, i32 -> vector<2x16xf32>
    %c4 = arith.constant 4 : index
    %91 = memref.load %arg1[%c4] : memref<14xf32, #tpu.memory_space<smem>>
    %92 = vector.broadcast %91 : f32 to vector<2x16xf32>
    %93 = arith.mulf %92, %89 : vector<2x16xf32>
    %c11 = arith.constant 11 : index
    %94 = memref.load %arg1[%c11] : memref<14xf32, #tpu.memory_space<smem>>
    %95 = vector.broadcast %94 : f32 to vector<2x16xf32>
    %96 = arith.mulf %95, %90 : vector<2x16xf32>
    %97 = arith.addf %93, %96 : vector<2x16xf32>
    %c1_i32_25 = arith.constant 1 : i32
    %98 = vector.broadcast %c1_i32_25 : i32 to vector<2x16xi32>
    %99 = arith.addi %5, %98 : vector<2x16xi32>
    %c0_i32_26 = arith.constant 0 : i32
    %100 = vector.broadcast %c0_i32_26 : i32 to vector<2x16xi32>
    %101 = arith.cmpi sge, %99, %100 : vector<2x16xi32>
    %c1_i32_27 = arith.constant 1 : i32
    %102 = vector.broadcast %c1_i32_27 : i32 to vector<2x16xi32>
    %103 = arith.addi %5, %102 : vector<2x16xi32>
    %c16_i32_28 = arith.constant 16 : i32
    %104 = vector.broadcast %c16_i32_28 : i32 to vector<2x16xi32>
    %105 = arith.cmpi slt, %103, %104 : vector<2x16xi32>
    %106 = arith.andi %101, %105 : vector<2x16xi1>
    %cst_29 = arith.constant 0.000000e+00 : f32
    %107 = vector.broadcast %cst_29 : f32 to vector<2x16xf32>
    %108 = arith.select %106, %97, %107 : vector<2x16xi1>, vector<2x16xf32>
    %109 = arith.addf %88, %108 : vector<2x16xf32>
    %c14_i32 = arith.constant 14 : i32
    %110 = tpu.dynamic_rotate %3 by %c14_i32 dim 1 : vector<2x16xf32>, i32 -> vector<2x16xf32>
    %c14_i32_30 = arith.constant 14 : i32
    %111 = tpu.dynamic_rotate %4 by %c14_i32_30 dim 1 : vector<2x16xf32>, i32 -> vector<2x16xf32>
    %c5 = arith.constant 5 : index
    %112 = memref.load %arg1[%c5] : memref<14xf32, #tpu.memory_space<smem>>
    %113 = vector.broadcast %112 : f32 to vector<2x16xf32>
    %114 = arith.mulf %113, %110 : vector<2x16xf32>
    %c12 = arith.constant 12 : index
    %115 = memref.load %arg1[%c12] : memref<14xf32, #tpu.memory_space<smem>>
    %116 = vector.broadcast %115 : f32 to vector<2x16xf32>
    %117 = arith.mulf %116, %111 : vector<2x16xf32>
    %118 = arith.addf %114, %117 : vector<2x16xf32>
    %c2_i32_31 = arith.constant 2 : i32
    %119 = vector.broadcast %c2_i32_31 : i32 to vector<2x16xi32>
    %120 = arith.addi %5, %119 : vector<2x16xi32>
    %c0_i32_32 = arith.constant 0 : i32
    %121 = vector.broadcast %c0_i32_32 : i32 to vector<2x16xi32>
    %122 = arith.cmpi sge, %120, %121 : vector<2x16xi32>
    %c2_i32_33 = arith.constant 2 : i32
    %123 = vector.broadcast %c2_i32_33 : i32 to vector<2x16xi32>
    %124 = arith.addi %5, %123 : vector<2x16xi32>
    %c16_i32_34 = arith.constant 16 : i32
    %125 = vector.broadcast %c16_i32_34 : i32 to vector<2x16xi32>
    %126 = arith.cmpi slt, %124, %125 : vector<2x16xi32>
    %127 = arith.andi %122, %126 : vector<2x16xi1>
    %cst_35 = arith.constant 0.000000e+00 : f32
    %128 = vector.broadcast %cst_35 : f32 to vector<2x16xf32>
    %129 = arith.select %127, %118, %128 : vector<2x16xi1>, vector<2x16xf32>
    %130 = arith.addf %109, %129 : vector<2x16xf32>
    %c13_i32 = arith.constant 13 : i32
    %131 = tpu.dynamic_rotate %3 by %c13_i32 dim 1 : vector<2x16xf32>, i32 -> vector<2x16xf32>
    %c13_i32_36 = arith.constant 13 : i32
    %132 = tpu.dynamic_rotate %4 by %c13_i32_36 dim 1 : vector<2x16xf32>, i32 -> vector<2x16xf32>
    %c6 = arith.constant 6 : index
    %133 = memref.load %arg1[%c6] : memref<14xf32, #tpu.memory_space<smem>>
    %134 = vector.broadcast %133 : f32 to vector<2x16xf32>
    %135 = arith.mulf %134, %131 : vector<2x16xf32>
    %c13 = arith.constant 13 : index
    %136 = memref.load %arg1[%c13] : memref<14xf32, #tpu.memory_space<smem>>
    %137 = vector.broadcast %136 : f32 to vector<2x16xf32>
    %138 = arith.mulf %137, %132 : vector<2x16xf32>
    %139 = arith.addf %135, %138 : vector<2x16xf32>
    %c3_i32_37 = arith.constant 3 : i32
    %140 = vector.broadcast %c3_i32_37 : i32 to vector<2x16xi32>
    %141 = arith.addi %5, %140 : vector<2x16xi32>
    %c0_i32_38 = arith.constant 0 : i32
    %142 = vector.broadcast %c0_i32_38 : i32 to vector<2x16xi32>
    %143 = arith.cmpi sge, %141, %142 : vector<2x16xi32>
    %c3_i32_39 = arith.constant 3 : i32
    %144 = vector.broadcast %c3_i32_39 : i32 to vector<2x16xi32>
    %145 = arith.addi %5, %144 : vector<2x16xi32>
    %c16_i32_40 = arith.constant 16 : i32
    %146 = vector.broadcast %c16_i32_40 : i32 to vector<2x16xi32>
    %147 = arith.cmpi slt, %145, %146 : vector<2x16xi32>
    %148 = arith.andi %143, %147 : vector<2x16xi1>
    %cst_41 = arith.constant 0.000000e+00 : f32
    %149 = vector.broadcast %cst_41 : f32 to vector<2x16xf32>
    %150 = arith.select %148, %139, %149 : vector<2x16xi1>, vector<2x16xf32>
    %151 = arith.addf %130, %150 : vector<2x16xf32>
    %152 = arith.negf %151 : vector<2x16xf32>
    %153 = math.exp %152 : vector<2x16xf32>
    %cst_42 = arith.constant 1.000000e+00 : f32
    %154 = vector.broadcast %cst_42 : f32 to vector<2x16xf32>
    %155 = arith.addf %154, %153 : vector<2x16xf32>
    %156 = arith.divf %154, %155 : vector<2x16xf32>
    %c0_43 = arith.constant 0 : index
    %c0_44 = arith.constant 0 : index
    %157 = vector.load %arg3[%c0_43, %c0_44] : memref<2x16xf32, #tpu.memory_space<vmem>>, vector<2x16xf32>
    tpu.vector_store %arg3[%c0_43, %c0_44], %156 {strides = array<i32>} : memref<2x16xf32, #tpu.memory_space<vmem>>, vector<2x16xf32>,
    return
  }
  func.func @transform_0(%arg0: i32) -> i32 {
    %c0_i32 = arith.constant 0 : i32
    %c0_i32_0 = arith.constant 0 : i32
    return %c0_i32 : i32
  }
  func.func @transform_1(%arg0: i32) -> (i32, i32, i32) {
    %c0_i32 = arith.constant 0 : i32
    %c0_i32_0 = arith.constant 0 : i32
    %c0_i32_1 = arith.constant 0 : i32
    return %arg0, %c0_i32, %c0_i32_0 : i32, i32, i32
  }
  func.func @transform_2(%arg0: i32) -> (i32, i32) {
    %c0_i32 = arith.constant 0 : i32
    %c0_i32_0 = arith.constant 0 : i32
    return %arg0, %c0_i32 : i32, i32
  }
}

</mosaic_0001>

<bundles_post_ra>
// kernel: tpu_custom_call.1
= control target key start
LH: loop header
LB: loop body
LE: loop exit
PB: predicated region body
PF: predicated region fallthrough
CT: control target
= control target key end

     0   :  { %7 = vsyncpa [#allocation5], 0  ;;  %s421_s0 = inlined_call_operand.hbm [shape: f32[14], index: 0, kind: input, shape index: {}]   ;;  %s422_s1 = inlined_call_operand.hbm [shape: f32[2,4,16], index: 1, kind: input, shape index: {}]   ;;  %s423_s2 = inlined_call_operand.hbm [shape: f32[2,16], index: 2, kind: output, shape index: {}]  }
   0x1   :  { %8 = vsyncpa [#allocation3], 0 }
   0x2   :  { %9 = vsyncpa [#allocation4], 0  ;;  %s270_s11 = scalar_lea.hbm %s421_s0, 16 }
   0x3   :  { %p271_p0 = scmp.ne.s32.totalorder %s421_s0, %s270_s11  ;;  %p274_p1 = scmp.lt.u32.totalorder %s270_s11, %s421_s0 }
   0x5   :  { %p276_p2 = pnand %p274_p1, %p271_p0 }
   0x7   :  { %279 = shalt.err (!%p276_p2)
}
   0x8   :  { %s330_s16 = smov [#allocation2]   ;;  %s331_s19 = smov [#allocation6]  }
   0x9   :  { %17 = dma.hbm_to_smem %s421_s0, 16, %s330_s16, [#allocation5]  }
   0xa   :  { %s23_s20 = sshll.u32 %s331_s19, 4  ;;  %s280_s23 = scalar_lea.hbm %s422_s1, 128  ;;  %s24_s20 = int_to_ptr.vmem [resolvable:$true] %s23_s20 }
   0xb   :  { %p281_p3 = scmp.ne.s32.totalorder %s422_s1, %s280_s23  ;;  %p284_p4 = scmp.lt.u32.totalorder %s280_s23, %s422_s1 }
   0xd   :  { %p286_p5 = pnand %p284_p4, %p281_p3 }
   0xf   :  { %289 = shalt.err (!%p286_p5)
}
  0x10   :  { %s290_s28 = scalar_lea.vmem %s24_s20, 128  ;;  %p295_p7 = scmp.lt.s32.totalorder %s24_s20, %s24_s20 }
  0x11   :  { %p291_p6 = scmp.ne.s32.totalorder %s24_s20, %s290_s28  ;;  %p296_p8 = scmp.lt.s32.totalorder %s290_s28, %s290_s28 }
  0x13   :  { %p297_p9 = por %p296_p8, %p295_p7 }
  0x15   :  { %p298_p10 = pnand %p297_p9, %p291_p6 }
  0x17   :  { %301 = shalt.err (!%p298_p10)
}
  0x18   :  { %s332_s0 = smov 64   ;;  %s333_s29 = smov 4  }
  0x19   :  { %29 = dma.hbm_to_vmem [thread:$0]  %s422_s1, 128, %s24_s20, [#allocation3], %s332_s0, %s332_s0, %s333_s29  }
  0x1a   :  { %324 = dma.done.wait [#allocation5], 16  }
  0x1b   :  { %325 = vsyncadd [#allocation5], 4294967280 }
  0x1c   :  { %326 = dma.done.wait [#allocation3], 128  }
  0x1d   :  { %327 = vsyncadd [#allocation3], 4294967168 }
  0x1e   :  { %36 = sfence }
  0x1f   :  { %v37_v0 = vld [vmem:[#allocation6] sm:$0xf]  ;;  %v38_v1 = vld [vmem:[#allocation6 + $0x4] sm:$0xf]  ;;  %vm39_vm0 = vcmask 125952   ;;  %vm75_vm1 = vcmask 1041409  }
  0x20   :  { %v40_v2 = vsel %vm39_vm0, %v37_v0, 0.0  ;;  %v47_v3 = vsel %vm39_vm0, %v38_v1, 0.0  ;;  %v57_v4 = vsel %vm39_vm0, %v37_v0, -inf  ;;  %v64_v8 = vsel %vm39_vm0, %v38_v1, -inf  ;;  %s334_s1 = smov 16   ;;  %s245_s4 = sld [smem:[#allocation2 + $0x3]] }
  0x21   :  { %v41_v5 = vrot.slane %v40_v2, 4  ;;  %v48_v6 = vrot.slane %v47_v3, 4  ;;  %v58_v7 = vrot.slane %v57_v4, 4  ;;  %v65_v9 = vrot.slane %v64_v8, 4  ;;  %s246_s5 = sld [smem:[#allocation2 + $0xa]]  ;;  %s241_s6 = sld [smem:[#allocation2 + $0x1]] }
  0x22   :  { %vm78_vm2 = vcmask 1047680   ;;  %s95_s7 = sld [smem:[#allocation2]]  ;;  %s240_s9 = sld [smem:[#allocation2 + $0x7]]  ;;  %vm222_vm0 = vcmask 123904  }
  0x23   :  { %v42_v10 = vadd.f32 %v41_v5, %v40_v2  ;;  %v49_v11 = vadd.f32 %v48_v6, %v47_v3  ;;  %v59_v12 = vmax.f32 %v57_v4, %v58_v7  ;;  %v66_v13 = vmax.f32 %v64_v8, %v65_v9  ;;  %s242_s8 = sld [smem:[#allocation2 + $0x8]]  ;;  %s248_s10 = sld [smem:[#allocation2 + $0xb]] }
  0x24   :  { %s244_s11 = sld [smem:[#allocation2 + $0x9]]  ;;  %s385_s12 = sld [smem:[#allocation2 + $0x4]] }
  0x25   :  { %v43_v14 = vrot.slane %v42_v10, 2  ;;  %v50_v15 = vrot.slane %v49_v11, 2  ;;  %v60_v16 = vrot.slane %v59_v12, 2  ;;  %v67_v17 = vrot.slane %v66_v13, 2  ;;  %s387_s13 = sld [smem:[#allocation2 + $0x2]]  ;;  %s389_s14 = sld [smem:[#allocation2 + $0xd]] }
  0x26   :  { %v147_v38 = vstv %s245_s4  ;;  %s391_s15 = sld [smem:[#allocation2 + $0xc]]  ;;  %s394_s16 = sld [smem:[#allocation2 + $0x6]] }
  0x27   :  { %v44_v18 = vadd.f32 %v43_v14, %v42_v10  ;;  %v51_v19 = vadd.f32 %v50_v15, %v49_v11  ;;  %v61_v20 = vmax.f32 %v59_v12, %v60_v16  ;;  %v68_v21 = vmax.f32 %v66_v13, %v67_v17  ;;  %s396_s17 = sld [smem:[#allocation2 + $0x5]]  ;;  %s335_s18 = smov 114  }
  0x28   :  { %v151_v39 = vstv %s246_s5  ;;  %v113_v47 = vstv %s241_s6  ;;  %v96_v48 = vstv %s95_s7  ;;  %v99_v51 = vstv %s240_s9  ;;  %s336_s19 = smov 115   ;;  %s337_s20 = smov 127  }
  0x29   :  { %v45_v22 = vrot.slane %v44_v18, 1  ;;  %v52_v23 = vrot.slane %v51_v19, 1  ;;  %v62_v24 = vrot.slane %v61_v20, 1  ;;  %v69_v25 = vrot.slane %v68_v21, 1  ;;  %s338_s21 = smov 113   ;;  %s339_s22 = smov 125  }
  0x2a   :  { %v116_v50 = vstv %s242_s8  ;;  %v169_v55 = vstv %s248_s10  ;;  %v133_v56 = vstv %s244_s11  ;;  %v166_v61 = vstv %s385_s12  ;;  %s340_s23 = smov 126   ;;  %s341_s24 = smov [#allocation7]  }
  0x2b   :  { %v46_v26 = vadd.f32 %v45_v22, %v44_v18  ;;  %v53_v27 = vadd.f32 %v52_v23, %v51_v19  ;;  %v63_v30 = vmax.f32 %v61_v20, %v62_v24  ;;  %v70_v31 = vmax.f32 %v68_v21, %v69_v25  ;;  %s230_s25 = sshll.u32 %s341_s24, 4  ;;  %s231_s25 = int_to_ptr.vmem [resolvable:$true] %s230_s25 }
  0x2c   :  { %v130_v62 = vstv %s387_s13  ;;  %v203_v3 = vstv %s389_s14  ;;  %v186_v4 = vstv %s391_s15  ;;  %v200_v7 = vstv %s394_s16  ;;  %s302_s26 = scalar_lea.vmem %s231_s25, 32  ;;  %p307_p12 = scmp.lt.s32.totalorder %s231_s25, %s231_s25 }
  0x2d   :  { %v55_v28 = vmul.f32 0.25, %v46_v26  ;;  %v56_v29 = vmul.f32 0.25, %v53_v27  ;;  %v87_v33 = vsel %vm75_vm1, %v70_v31, %v63_v30  ;;  %v152_v42 = vmul.f32 %v151_v39, %v63_v30  ;;  %p303_p11 = scmp.ne.s32.totalorder %s231_s25, %s302_s26  ;;  %p308_p13 = scmp.lt.s32.totalorder %s302_s26, %s302_s26 }
  0x2e   :  { %v153_v43 = vmul.f32 %v151_v39, %v70_v31  ;;  %v183_v8 = vstv %s396_s17  ;;  %v71_v17 = vlaneseq }
  0x2f   :  { %v76_v32 = vsel %vm75_vm1, %v56_v29, %v55_v28  ;;  %v148_v40 = vmul.f32 %v147_v38, %v55_v28  ;;  %v149_v41 = vmul.f32 %v147_v38, %v56_v29  ;;  %p309_p0 = por %p308_p13, %p307_p12 }
  0x30   :  { %79 = vrot.lane.b32.xlu0 %v76_v32, %s334_s1  ;;  %v72_v18 = vand.u32 127, %v71_v17 }
  0x31   :  { %v154_v45 = vadd.f32 %v152_v42, %v148_v40  ;;  %v155_v46 = vadd.f32 %v153_v43, %v149_v41  ;;  %p310_p1 = pnand %p309_p0, %p303_p11 }
  0x32   :  { %v119_v19 = vadd.s32 4294967294, %v72_v18  ;;  %v102_v20 = vadd.s32 4294967293, %v72_v18  ;;  %v136_v21 = vadd.s32 4294967295, %v72_v18  ;;  %v172_v26 = vadd.s32 1, %v72_v18 }
  0x33   :  { %v399_v52 = vsel %vm75_vm1, %v155_v46, %v154_v45  ;;  %vm157_vm12 = vcmp.lt.s32.totalorder %v72_v18, 16  ;;  %v189_v30 = vadd.s32 2, %v72_v18 }
  0x34   :  { %89 = vrot.lane.b32.xlu0 %v87_v33, %s334_s1  ;;  %vm120_vm3 = vcmp.ge.s32.totalorder %v119_v19, 0  ;;  %vm121_vm4 = vcmp.lt.s32.totalorder %v119_v19, 16  ;;  %vm103_vm5 = vcmp.ge.s32.totalorder %v102_v20, 0  ;;  %vm104_vm6 = vcmp.lt.s32.totalorder %v102_v20, 16 }
  0x35   :  { %vm122_vm7 = vmand %vm120_vm3, %vm121_vm4  ;;  %vm137_vm9 = vcmp.ge.s32.totalorder %v136_v21, 0  ;;  %vm138_vm10 = vcmp.lt.s32.totalorder %v136_v21, 16  ;;  %v163_v31 = vsel %vm157_vm12, %v399_v52, 0.0  ;;  %vm174_vm13 = vcmp.lt.s32.totalorder %v172_v26, 16 }
  0x36   :  { %vm105_vm8 = vmand %vm103_vm5, %vm104_vm6  ;;  %vm191_vm14 = vcmp.lt.s32.totalorder %v189_v30, 16 }
  0x37   :  { %vm139_vm11 = vmand %vm137_vm9, %vm138_vm10 }
  0xa2   :  { %v80_v34 = vpop.permute.xlu0 %79 }
  0xa3   :  { %v81_v35 = vsel %vm78_vm2, %v80_v34, %v76_v32  ;;  %v206_v34 = vadd.s32 3, %v72_v18 }
  0xa4   :  { %82 = vrot.lane.b32.xlu1 %v81_v35, %s334_s1 }
  0xa5   :  { %vm208_vm15 = vcmp.lt.s32.totalorder %v206_v34, 16 }
  0xa6   :  { %v90_v36 = vpop.permute.xlu0 %89 }
  0xa7   :  { %v91_v37 = vsel %vm78_vm2, %v90_v36, %v87_v33 }
  0xa8   :  { %92 = vrot.lane.b32.xlu1 %v91_v37, %s334_s1 }
 0x116   :  { %v83_v44 = vpop.permute.xlu1 %82 }
 0x117   :  { %v84_v49 = vsel %vm78_vm2, %v83_v44, %v76_v32 }
 0x118   :  { %v114_v57 = vmul.f32 %v113_v47, %v84_v49  ;;  %v97_v59 = vmul.f32 %v96_v48, %v84_v49  ;;  %v167_v5 = vmul.f32 %v166_v61, %v84_v49  ;;  %v131_v6 = vmul.f32 %v130_v62, %v84_v49 }
 0x119   :  { %v201_v13 = vmul.f32 %v200_v7, %v84_v49  ;;  %v184_v14 = vmul.f32 %v183_v8, %v84_v49 }
 0x11a   :  { %v93_v53 = vpop.permute.xlu1 %92 }
 0x11b   :  { %v94_v54 = vsel %vm78_vm2, %v93_v53, %v87_v33 }
 0x11c   :  { %v117_v58 = vmul.f32 %v116_v50, %v94_v54  ;;  %v100_v60 = vmul.f32 %v99_v51, %v94_v54  ;;  %v170_v1 = vmul.f32 %v169_v55, %v94_v54  ;;  %v134_v2 = vmul.f32 %v133_v56, %v94_v54 }
 0x11d   :  { %v204_v11 = vmul.f32 %v203_v3, %v94_v54  ;;  %v187_v12 = vmul.f32 %v186_v4, %v94_v54 }
 0x11e   :  { %v118_v63 = vadd.f32 %v117_v58, %v114_v57  ;;  %v101_v0 = vadd.f32 %v100_v60, %v97_v59  ;;  %v171_v9 = vadd.f32 %v170_v1, %v167_v5  ;;  %v135_v10 = vadd.f32 %v134_v2, %v131_v6 }
 0x11f   :  { %v205_v15 = vadd.f32 %v204_v11, %v201_v13  ;;  %v188_v16 = vadd.f32 %v187_v12, %v184_v14 }
 0x120   :  { %124 = vrot.lane.b32.xlu1 %v118_v63, %s335_s18  ;;  %107 = vrot.lane.b32.xlu0 %v101_v0, %s336_s19 }
 0x124   :  { %177 = vrot.lane.b32.xlu1 %v171_v9, %s337_s20  ;;  %141 = vrot.lane.b32.xlu0 %v135_v10, %s338_s21 }
 0x128   :  { %211 = vrot.lane.b32.xlu1 %v205_v15, %s339_s22  ;;  %194 = vrot.lane.b32.xlu0 %v188_v16, %s340_s23 }
 0x192   :  { %v125_v22 = vpop.permute.xlu1 %124  ;;  %v108_v23 = vpop.permute.xlu0 %107 }
 0x193   :  { %v127_v24 = vsel %vm122_vm7, %v125_v22, 0.0  ;;  %v110_v25 = vsel %vm105_vm8, %v108_v23, 0.0 }
 0x194   :  { %v128_v27 = vadd.f32 %v127_v24, %v110_v25 }
 0x196   :  { %v178_v28 = vpop.permute.xlu1 %177  ;;  %v142_v29 = vpop.permute.xlu0 %141 }
 0x197   :  { %v144_v32 = vsel %vm139_vm11, %v142_v29, 0.0  ;;  %v180_v37 = vsel %vm174_vm13, %v178_v28, 0.0 }
 0x198   :  { %v145_v33 = vadd.f32 %v144_v32, %v128_v27 }
 0x19a   :  { %v164_v35 = vadd.f32 %v163_v31, %v145_v33  ;;  %v195_v36 = vpop.permute.xlu0 %194  ;;  %v212_v38 = vpop.permute.xlu1 %211 }
 0x19b   :  { %v197_v40 = vsel %vm191_vm14, %v195_v36, 0.0  ;;  %v214_v42 = vsel %vm208_vm15, %v212_v38, 0.0 }
 0x19c   :  { %v181_v39 = vadd.f32 %v180_v37, %v164_v35 }
 0x19e   :  { %v198_v41 = vadd.f32 %v197_v40, %v181_v39 }
 0x1a0   :  { %v215_v43 = vadd.f32 %v214_v42, %v198_v41 }
 0x1a2   :  { %v253_v44 = vmul.f32 -1.442695, %v215_v43 }
 0x1a4   :  { %266 = vpow2.f32 %v253_v44 }
 0x1ae   :  { %v267_v45 = vpop.eup %266 }
 0x1af   :  { %v219_v46 = vadd.f32 1.0, %v267_v45 }
 0x1b1   :  { %268 = vrcp.f32 %v219_v46 }
 0x1bb   :  { %v269_v47 = vpop.eup %268 }
 0x1bc   :  { %223 = vst.msk [vmem:[#allocation7] sm:$0x3] %vm222_vm0, %v269_v47 }
 0x1bd   :  { %313 = shalt.err (!%p310_p1)
}
 0x1be   :  { %s314_s0 = scalar_lea.hbm %s423_s2, 32 }
 0x1bf   :  { %p315_p2 = scmp.ne.s32.totalorder %s423_s2, %s314_s0  ;;  %p318_p3 = scmp.lt.u32.totalorder %s314_s0, %s423_s2 }
 0x1c1   :  { %p320_p4 = pnand %p318_p3, %p315_p2 }
 0x1c3   :  { %323 = shalt.err (!%p320_p4)
}
 0x1c4   :  { %233 = dma.vmem_to_hbm [thread:$0]  %s231_s25, 32, %s423_s2, [#allocation4]  }
 0x1c5   :  { %328 = dma.done.wait [#allocation4], 32  }
 0x1c6   :  { %329 = vsyncadd [#allocation4], 4294967264 }
 0x1c7   :  { %237 = vsyncpa [#allocation3], 1 }
 0x1c8   :  { %238 = vsyncpa [#allocation4], 1 }
 0x1c9   :  { %239 = vsyncpa [#allocation5], 1 }

</bundles_post_ra>
